<compile_context>
chip_gen: v6e
topology: v6e:2x2x1
jax: 0.10.0
libtpu: 0.0.40
codegen_flags: <defaults>
</compile_context>

<pallas_src>
import jax
import jax.numpy as jnp
from jax.experimental import pallas as pl
from jax.experimental.pallas import tpu as pltpu


def _round_up(x, m):
    return ((x + m - 1) // m) * m


def _cdiv(a, b):
    return -(-a // b)


def _pad2d(a, rows, cols):
    pr, pc = rows - a.shape[0], cols - a.shape[1]
    if pr == 0 and pc == 0:
        return a
    return jnp.pad(a, ((0, pr), (0, pc)))


def _vmem_capacity_bytes(default=64 << 20):
    """Physical VMEM per TensorCore; conservative 64 MiB (v7x) fallback."""
    try:
        info = pltpu.get_tpu_info()
        cap = getattr(info, "vmem_capacity_bytes", None)
        if cap:
            return int(cap)
    except Exception:
        pass
    return default


def _spec(shape, index_map, single_buffer=False):
    """BlockSpec; request single-buffering for grid-constant blocks when possible."""
    if single_buffer:
        try:
            return pl.BlockSpec(shape, index_map, pipeline_mode=pl.Buffered(1))
        except (AttributeError, TypeError):
            pass
    return pl.BlockSpec(shape, index_map)


def _ffn_kernel(x_ref, w1_ref, b1_ref, w2_ref, b2_ref, o_ref, acc_ref):
    # x_ref:  (tile_m, dim_p)   streamed per token tile (constant across hidden axis)
    # w1_ref: (dim_p, tile_h)   streamed per hidden chunk
    # b1_ref: (1, tile_h)       streamed per hidden chunk
    # w2_ref: (tile_h, dim_p)   streamed per hidden chunk
    # b2_ref: (1, dim_p)        grid-constant
    # acc_ref: (tile_m, dim_p)  f32 accumulator scratch
    h_idx = pl.program_id(1)

    @pl.when(h_idx == 0)
    def _():
        acc_ref[...] = jnp.zeros_like(acc_ref)

    x = x_ref[...]
    # First linear chunk (MXU) with f32 accumulation; bias added in f32.
    h = jnp.dot(x, w1_ref[...], preferred_element_type=jnp.float32) + b1_ref[...]
    # Exact (erf) GELU -- matches PyTorch nn.GELU() default.
    h = 0.5 * h * (1.0 + jax.lax.erf(h * jnp.float32(0.7071067811865476)))
    # Dropout(p=0.0) is the identity at inference; nothing to do.
    # Second linear chunk: accumulate partial products over hidden chunks in f32.
    acc_ref[...] += jnp.dot(h.astype(x.dtype), w2_ref[...],
                            preferred_element_type=jnp.float32)

    @pl.when(h_idx == pl.num_programs(1) - 1)
    def _():
        o_ref[...] = (acc_ref[...] + b2_ref[...]).astype(o_ref.dtype)


def feedforward_pallas(x, w1, b1, w2, b2, *, base_tile_m=512):
    """x: (..., dim). w1: (dim, hidden), b1: (hidden,)/(1,hidden),
    w2: (hidden, dim), b2: (dim,)/(1,dim). Returns same shape/dtype as x."""
    orig_shape = x.shape
    dim = orig_shape[-1]
    hidden = w1.shape[1]
    b1 = b1.reshape(1, hidden)
    b2 = b2.reshape(1, dim)

    x2d = x.reshape(-1, dim)
    n = x2d.shape[0]

    x_item = jnp.dtype(x.dtype).itemsize
    w_item = jnp.dtype(w1.dtype).itemsize
    b2_item = jnp.dtype(b2.dtype).itemsize
    sub = 8 if x_item >= 4 else 16            # sublane granularity (16 for packed 16-bit)
    lane = 128
    dim_p = _round_up(dim, lane)

    # ---- Token tile: balanced (no nearly-empty last tile), sublane-aligned, and
    # ---- >= 2 grid steps whenever possible so v7x's two TensorCores both work.
    tile_m = min(base_tile_m, _round_up(n, sub))
    tile_m = _round_up(_cdiv(n, _cdiv(n, tile_m)), sub)
    if _round_up(n, tile_m) // tile_m < 2 and n > sub:
        tile_m = _round_up(_cdiv(n, 2), sub)

    # ---- Hidden chunk candidates: multiples of 256 (v6e/v7x MXU) when hidden > 256.
    hid_p128 = _round_up(hidden, 128)
    if hid_p128 <= 256:
        h_cands = [hid_p128]
    else:
        h_cands = []
        th = _round_up(hidden, 256)
        while th >= 256:
            h_cands.append(th)
            if th == 256:
                break
            th = _round_up(th // 2, 256)

    def vmem_bytes(tm, th, gh):
        nbuf_w = 2 if gh > 1 else 1           # streamed chunks double-buffer; resident = 1
        return (
            2 * tm * dim_p * x_item           # x tile (double-buffered)
            + 2 * tm * dim_p * x_item         # out tile (double-buffered)
            + nbuf_w * dim_p * th * w_item    # w1 chunk(s)
            + nbuf_w * th * w_item            # b1 chunk(s)
            + nbuf_w * th * dim_p * w_item    # w2 chunk(s)
            + dim_p * b2_item                 # b2 (single-buffered)
            + tm * dim_p * 4                  # f32 accumulator scratch
            + tm * th * 4                     # f32 intermediate h
            + tm * th * x_item                # h downcast before second dot
        )

    # ---- Generation-aware VMEM budget (leave ~20% headroom for compiler scratch).
    vmem_cap = _vmem_capacity_bytes()
    budget = int(vmem_cap * 0.80)

    tile_h = None
    while tile_h is None:
        for th in h_cands:                    # largest chunk first
            gh = _round_up(hidden, th) // th
            if vmem_bytes(tile_m, th, gh) <= budget:
                tile_h = th
                break
        if tile_h is None:
            if tile_m <= sub:
                tile_h = h_cands[-1]          # smallest chunk; honest limit below
            else:
                tile_m = max(_round_up(tile_m // 2, sub), sub)

    hid_pad = _round_up(hidden, tile_h)
    grid_h = hid_pad // tile_h
    n_p = _round_up(n, tile_m)
    grid_m = n_p // tile_m

    vmem_est = vmem_bytes(tile_m, tile_h, grid_h)
    # Extra slack in case single-buffering of resident weights is not honoured.
    slack = ((2 * tile_h * dim_p + tile_h) * w_item) if grid_h == 1 else 0
    vmem_limit = int(min(vmem_cap, max(32 << 20, vmem_est + slack + (8 << 20))))

    # ---- Padding (zero padding is exact: padded hidden cols get bias 0 and GELU(0)=0,
    # ---- padded w2 rows/cols contribute nothing, padded out cols are sliced off).
    # ---- Pads are skipped entirely when the shapes are already aligned.
    x_p = _pad2d(x2d, n_p, dim_p)
    w1_p = _pad2d(w1, dim_p, hid_pad)
    b1_p = _pad2d(b1, 1, hid_pad)
    w2_p = _pad2d(w2, hid_pad, dim_p)
    b2_p = _pad2d(b2, 1, dim_p)

    # ---- Cost hint so XLA schedules neighbouring ops around the custom call.
    w_reads = grid_m if grid_h > 1 else 1
    cost = pl.CostEstimate(
        flops=int(4 * n_p * dim_p * hid_pad),                 # two matmuls
        transcendentals=int(n_p * hid_pad),                   # erf
        bytes_accessed=int(
            2 * n_p * dim_p * x_item                          # x in + out
            + w_reads * (dim_p * hid_pad + hid_pad * dim_p + hid_pad) * w_item
            + dim_p * b2_item),
    )

    resident = grid_h == 1

    def make_in_specs(allow_single):
        return [
            pl.BlockSpec((tile_m, dim_p), lambda i, h: (i, 0)),                       # x
            _spec((dim_p, tile_h), lambda i, h: (0, h), allow_single and resident),   # w1
            _spec((1, tile_h), lambda i, h: (0, h), allow_single and resident),       # b1
            _spec((tile_h, dim_p), lambda i, h: (h, 0), allow_single and resident),   # w2
            _spec((1, dim_p), lambda i, h: (0, 0), allow_single),                     # b2
        ]

    def run(allow_single):
        return pl.pallas_call(
            _ffn_kernel,
            out_shape=jax.ShapeDtypeStruct((n_p, dim_p), x.dtype),
            grid_spec=pltpu.PrefetchScalarGridSpec(
                num_scalar_prefetch=0,
                grid=(grid_m, grid_h),
                in_specs=make_in_specs(allow_single),
                out_specs=pl.BlockSpec((tile_m, dim_p), lambda i, h: (i, 0)),
                scratch_shapes=[pltpu.VMEM((tile_m, dim_p), jnp.float32)],
            ),
            compiler_params=pltpu.CompilerParams(
                dimension_semantics=("parallel", "arbitrary"),
                vmem_limit_bytes=vmem_limit,
            ),
            cost_estimate=cost,
        )(x_p, w1_p, b1_p, w2_p, b2_p)

    try:
        out = run(True)
        jax.block_until_ready(out)
    except Exception:
        # Fallback: default double-buffering everywhere (costs a little extra VMEM).
        out = run(False)

    if n_p != n or dim_p != dim:
        out = out[:n, :dim]
    return out.reshape(orig_shape)


def _reference(x, w1, b1, w2, b2):
    h = jnp.dot(x, w1) + b1.reshape(-1)
    h = jax.nn.gelu(h, approximate=False)
    return jnp.dot(h, w2) + b2.reshape(-1)


if __name__ == "__main__":
    # Small shapes consistent with the module: tokens of width `dim`.
    batch, seq, dim, hidden_dim = 2, 8, 32, 64

    key = jax.random.PRNGKey(0)
    kx, kw1, kb1, kw2, kb2 = jax.random.split(key, 5)

    x = jax.random.normal(kx, (batch, seq, dim), dtype=jnp.float32)

    # Deterministic parameter init (uniform in +-1/sqrt(fan_in), like nn.Linear).
    lim1 = 1.0 / jnp.sqrt(dim)
    lim2 = 1.0 / jnp.sqrt(hidden_dim)
    w1 = jax.random.uniform(kw1, (dim, hidden_dim), jnp.float32, -lim1, lim1)
    b1 = jax.random.uniform(kb1, (hidden_dim,), jnp.float32, -lim1, lim1)
    w2 = jax.random.uniform(kw2, (hidden_dim, dim), jnp.float32, -lim2, lim2)
    b2 = jax.random.uniform(kb2, (dim,), jnp.float32, -lim2, lim2)

    out = feedforward_pallas(x, w1, b1, w2, b2)
    jax.block_until_ready(out)

    ref = _reference(x, w1, b1, w2, b2)
    assert out.shape == x.shape
    assert out.dtype == x.dtype
    assert jnp.allclose(out, ref, atol=1e-5, rtol=1e-5), "mismatch vs reference"

    print("KERNEL_OK")
</pallas_src>

<mosaic_0001>
module attributes {stable_mosaic.version = 11 : i64} {
  func.func @_ffn_kernel(%arg0: i32, %arg1: i32, %arg2: memref<8x128xf32, #tpu.memory_space<vmem>>, %arg3: memref<128x128xf32, #tpu.memory_space<vmem>>, %arg4: memref<1x128xf32, #tpu.memory_space<vmem>>, %arg5: memref<128x128xf32, #tpu.memory_space<vmem>>, %arg6: memref<1x128xf32, #tpu.memory_space<vmem>>, %arg7: memref<8x128xf32, #tpu.memory_space<vmem>>, %arg8: memref<8x128xf32, #tpu.memory_space<vmem>>) attributes {dimension_semantics = [#tpu.dimension_semantics<parallel>, #tpu.dimension_semantics<arbitrary>], iteration_bounds = array<i64: 2, 1>, scalar_prefetch = 0 : i64, scratch_operands = 1 : i64, tpu.core_type = #tpu.core_type<tc>, window_params = [{transform_indices = @transform_0, window_bounds = array<i64: 8, 128>}, {pipeline_mode = #tpu.pipeline_mode<synchronous>, transform_indices = @transform_1, window_bounds = array<i64: 128, 128>}, {pipeline_mode = #tpu.pipeline_mode<synchronous>, transform_indices = @transform_2, window_bounds = array<i64: 1, 128>}, {pipeline_mode = #tpu.pipeline_mode<synchronous>, transform_indices = @transform_3, window_bounds = array<i64: 128, 128>}, {pipeline_mode = #tpu.pipeline_mode<synchronous>, transform_indices = @transform_4, window_bounds = array<i64: 1, 128>}, {transform_indices = @transform_5, window_bounds = array<i64: 8, 128>}]} {
    %c0_i32 = arith.constant 0 : i32
    %0 = arith.cmpi eq, %arg1, %c0_i32 : i32
    %1 = arith.extui %0 : i1 to i32
    %c0_i32_0 = arith.constant 0 : i32
    %2 = arith.cmpi ne, %1, %c0_i32_0 : i32
    scf.if %2 {
      %cst_18 = arith.constant 0.000000e+00 : f32
      %25 = vector.broadcast %cst_18 : f32 to vector<8x128xf32>
      %c0_19 = arith.constant 0 : index
      %c0_20 = arith.constant 0 : index
      %26 = vector.load %arg8[%c0_19, %c0_20] : memref<8x128xf32, #tpu.memory_space<vmem>>, vector<8x128xf32>
      tpu.vector_store %arg8[%c0_19, %c0_20], %25 {strides = array<i32>} : memref<8x128xf32, #tpu.memory_space<vmem>>, vector<8x128xf32>,
    } else {
    }
    %c0 = arith.constant 0 : index
    %c0_1 = arith.constant 0 : index
    %3 = vector.load %arg2[%c0, %c0_1] : memref<8x128xf32, #tpu.memory_space<vmem>>, vector<8x128xf32>
    %c0_2 = arith.constant 0 : index
    %c0_3 = arith.constant 0 : index
    %4 = vector.load %arg3[%c0_2, %c0_3] : memref<128x128xf32, #tpu.memory_space<vmem>>, vector<128x128xf32>
    %cst = arith.constant dense<0.000000e+00> : vector<8x128xf32>
    %5 = tpu.matmul %3, %4, %cst {dimension_numbers = #tpu.dot_dimension_numbers<[1], [0], [0], [1], [0, 0, 1, 1], [], []>} : vector<8x128xf32>, vector<128x128xf32>, vector<8x128xf32> -> vector<8x128xf32>
    %c0_4 = arith.constant 0 : index
    %c0_5 = arith.constant 0 : index
    %6 = vector.load %arg4[%c0_4, %c0_5] : memref<1x128xf32, #tpu.memory_space<vmem>>, vector<1x128xf32>
    %7 = vector.broadcast %6 : vector<1x128xf32> to vector<8x128xf32>
    %8 = arith.addf %5, %7 : vector<8x128xf32>
    %cst_6 = arith.constant 5.000000e-01 : f32
    %9 = vector.broadcast %cst_6 : f32 to vector<8x128xf32>
    %10 = arith.mulf %9, %8 : vector<8x128xf32>
    %cst_7 = arith.constant 0.707106769 : f32
    %11 = vector.broadcast %cst_7 : f32 to vector<8x128xf32>
    %12 = arith.mulf %8, %11 : vector<8x128xf32>
    %13 = math.erf %12 : vector<8x128xf32>
    %cst_8 = arith.constant 1.000000e+00 : f32
    %14 = vector.broadcast %cst_8 : f32 to vector<8x128xf32>
    %15 = arith.addf %14, %13 : vector<8x128xf32>
    %16 = arith.mulf %10, %15 : vector<8x128xf32>
    %c0_9 = arith.constant 0 : index
    %c0_10 = arith.constant 0 : index
    %17 = vector.load %arg8[%c0_9, %c0_10] : memref<8x128xf32, #tpu.memory_space<vmem>>, vector<8x128xf32>
    %c0_11 = arith.constant 0 : index
    %c0_12 = arith.constant 0 : index
    %18 = vector.load %arg5[%c0_11, %c0_12] : memref<128x128xf32, #tpu.memory_space<vmem>>, vector<128x128xf32>
    %cst_13 = arith.constant dense<0.000000e+00> : vector<8x128xf32>
    %19 = tpu.matmul %16, %18, %cst_13 {dimension_numbers = #tpu.dot_dimension_numbers<[1], [0], [0], [1], [0, 0, 1, 1], [], []>} : vector<8x128xf32>, vector<128x128xf32>, vector<8x128xf32> -> vector<8x128xf32>
    %20 = arith.addf %17, %19 : vector<8x128xf32>
    %c0_14 = arith.constant 0 : index
    %c0_15 = arith.constant 0 : index
    %21 = vector.load %arg8[%c0_14, %c0_15] : memref<8x128xf32, #tpu.memory_space<vmem>>, vector<8x128xf32>
    tpu.vector_store %arg8[%c0_14, %c0_15], %20 {strides = array<i32>} : memref<8x128xf32, #tpu.memory_space<vmem>>, vector<8x128xf32>,
    %c0_i32_16 = arith.constant 0 : i32
    %22 = arith.cmpi eq, %arg1, %c0_i32_16 : i32
    %23 = arith.extui %22 : i1 to i32
    %c0_i32_17 = arith.constant 0 : i32
    %24 = arith.cmpi ne, %23, %c0_i32_17 : i32
    scf.if %24 {
      %c0_18 = arith.constant 0 : index
      %c0_19 = arith.constant 0 : index
      %25 = vector.load %arg8[%c0_18, %c0_19] : memref<8x128xf32, #tpu.memory_space<vmem>>, vector<8x128xf32>
      %c0_20 = arith.constant 0 : index
      %c0_21 = arith.constant 0 : index
      %26 = vector.load %arg6[%c0_20, %c0_21] : memref<1x128xf32, #tpu.memory_space<vmem>>, vector<1x128xf32>
      %27 = vector.broadcast %26 : vector<1x128xf32> to vector<8x128xf32>
      %28 = arith.addf %25, %27 : vector<8x128xf32>
      %c0_22 = arith.constant 0 : index
      %c0_23 = arith.constant 0 : index
      %29 = vector.load %arg7[%c0_22, %c0_23] : memref<8x128xf32, #tpu.memory_space<vmem>>, vector<8x128xf32>
      tpu.vector_store %arg7[%c0_22, %c0_23], %28 {strides = array<i32>} : memref<8x128xf32, #tpu.memory_space<vmem>>, vector<8x128xf32>,
    } else {
    }
    return
  }
  func.func @transform_0(%arg0: i32, %arg1: i32) -> (i32, i32) {
    %c0_i32 = arith.constant 0 : i32
    %c0_i32_0 = arith.constant 0 : i32
    return %arg0, %c0_i32 : i32, i32
  }
  func.func @transform_1(%arg0: i32, %arg1: i32) -> (i32, i32) {
    %c0_i32 = arith.constant 0 : i32
    %c0_i32_0 = arith.constant 0 : i32
    return %c0_i32, %arg1 : i32, i32
  }
  func.func @transform_2(%arg0: i32, %arg1: i32) -> (i32, i32) {
    %c0_i32 = arith.constant 0 : i32
    %c0_i32_0 = arith.constant 0 : i32
    return %c0_i32, %arg1 : i32, i32
  }
  func.func @transform_3(%arg0: i32, %arg1: i32) -> (i32, i32) {
    %c0_i32 = arith.constant 0 : i32
    %c0_i32_0 = arith.constant 0 : i32
    return %arg1, %c0_i32 : i32, i32
  }
  func.func @transform_4(%arg0: i32, %arg1: i32) -> (i32, i32) {
    %c0_i32 = arith.constant 0 : i32
    %c0_i32_0 = arith.constant 0 : i32
    %c0_i32_1 = arith.constant 0 : i32
    return %c0_i32, %c0_i32_0 : i32, i32
  }
  func.func @transform_5(%arg0: i32, %arg1: i32) -> (i32, i32) {
    %c0_i32 = arith.constant 0 : i32
    %c0_i32_0 = arith.constant 0 : i32
    return %arg0, %c0_i32 : i32, i32
  }
}

module attributes {stable_mosaic.version = 11 : i64} {
  func.func @_ffn_kernel(%arg0: i32, %arg1: i32, %arg2: memref<8x128xf32, #tpu.memory_space<vmem>>, %arg3: memref<128x128xf32, #tpu.memory_space<vmem>>, %arg4: memref<1x128xf32, #tpu.memory_space<vmem>>, %arg5: memref<128x128xf32, #tpu.memory_space<vmem>>, %arg6: memref<1x128xf32, #tpu.memory_space<vmem>>, %arg7: memref<8x128xf32, #tpu.memory_space<vmem>>, %arg8: memref<8x128xf32, #tpu.memory_space<vmem>>) attributes {dimension_semantics = [#tpu.dimension_semantics<parallel>, #tpu.dimension_semantics<arbitrary>], iteration_bounds = array<i64: 2, 1>, scalar_prefetch = 0 : i64, scratch_operands = 1 : i64, tpu.core_type = #tpu.core_type<tc>, window_params = [{transform_indices = @transform_0, window_bounds = array<i64: 8, 128>}, {transform_indices = @transform_1, window_bounds = array<i64: 128, 128>}, {transform_indices = @transform_2, window_bounds = array<i64: 1, 128>}, {transform_indices = @transform_3, window_bounds = array<i64: 128, 128>}, {pipeline_mode = #tpu.pipeline_mode<synchronous>, transform_indices = @transform_4, window_bounds = array<i64: 1, 128>}, {transform_indices = @transform_5, window_bounds = array<i64: 8, 128>}]} {
    %c0_i32 = arith.constant 0 : i32
    %0 = arith.cmpi eq, %arg1, %c0_i32 : i32
    %1 = arith.extui %0 : i1 to i32
    %c0_i32_0 = arith.constant 0 : i32
    %2 = arith.cmpi ne, %1, %c0_i32_0 : i32
    scf.if %2 {
      %cst_18 = arith.constant 0.000000e+00 : f32
      %25 = vector.broadcast %cst_18 : f32 to vector<8x128xf32>
      %c0_19 = arith.constant 0 : index
      %c0_20 = arith.constant 0 : index
      %26 = vector.load %arg8[%c0_19, %c0_20] : memref<8x128xf32, #tpu.memory_space<vmem>>, vector<8x128xf32>
      tpu.vector_store %arg8[%c0_19, %c0_20], %25 {strides = array<i32>} : memref<8x128xf32, #tpu.memory_space<vmem>>, vector<8x128xf32>,
    } else {
    }
    %c0 = arith.constant 0 : index
    %c0_1 = arith.constant 0 : index
    %3 = vector.load %arg2[%c0, %c0_1] : memref<8x128xf32, #tpu.memory_space<vmem>>, vector<8x128xf32>
    %c0_2 = arith.constant 0 : index
    %c0_3 = arith.constant 0 : index
    %4 = vector.load %arg3[%c0_2, %c0_3] : memref<128x128xf32, #tpu.memory_space<vmem>>, vector<128x128xf32>
    %cst = arith.constant dense<0.000000e+00> : vector<8x128xf32>
    %5 = tpu.matmul %3, %4, %cst {dimension_numbers = #tpu.dot_dimension_numbers<[1], [0], [0], [1], [0, 0, 1, 1], [], []>} : vector<8x128xf32>, vector<128x128xf32>, vector<8x128xf32> -> vector<8x128xf32>
    %c0_4 = arith.constant 0 : index
    %c0_5 = arith.constant 0 : index
    %6 = vector.load %arg4[%c0_4, %c0_5] : memref<1x128xf32, #tpu.memory_space<vmem>>, vector<1x128xf32>
    %7 = vector.broadcast %6 : vector<1x128xf32> to vector<8x128xf32>
    %8 = arith.addf %5, %7 : vector<8x128xf32>
    %cst_6 = arith.constant 5.000000e-01 : f32
    %9 = vector.broadcast %cst_6 : f32 to vector<8x128xf32>
    %10 = arith.mulf %9, %8 : vector<8x128xf32>
    %cst_7 = arith.constant 0.707106769 : f32
    %11 = vector.broadcast %cst_7 : f32 to vector<8x128xf32>
    %12 = arith.mulf %8, %11 : vector<8x128xf32>
    %13 = math.erf %12 : vector<8x128xf32>
    %cst_8 = arith.constant 1.000000e+00 : f32
    %14 = vector.broadcast %cst_8 : f32 to vector<8x128xf32>
    %15 = arith.addf %14, %13 : vector<8x128xf32>
    %16 = arith.mulf %10, %15 : vector<8x128xf32>
    %c0_9 = arith.constant 0 : index
    %c0_10 = arith.constant 0 : index
    %17 = vector.load %arg8[%c0_9, %c0_10] : memref<8x128xf32, #tpu.memory_space<vmem>>, vector<8x128xf32>
    %c0_11 = arith.constant 0 : index
    %c0_12 = arith.constant 0 : index
    %18 = vector.load %arg5[%c0_11, %c0_12] : memref<128x128xf32, #tpu.memory_space<vmem>>, vector<128x128xf32>
    %cst_13 = arith.constant dense<0.000000e+00> : vector<8x128xf32>
    %19 = tpu.matmul %16, %18, %cst_13 {dimension_numbers = #tpu.dot_dimension_numbers<[1], [0], [0], [1], [0, 0, 1, 1], [], []>} : vector<8x128xf32>, vector<128x128xf32>, vector<8x128xf32> -> vector<8x128xf32>
    %20 = arith.addf %17, %19 : vector<8x128xf32>
    %c0_14 = arith.constant 0 : index
    %c0_15 = arith.constant 0 : index
    %21 = vector.load %arg8[%c0_14, %c0_15] : memref<8x128xf32, #tpu.memory_space<vmem>>, vector<8x128xf32>
    tpu.vector_store %arg8[%c0_14, %c0_15], %20 {strides = array<i32>} : memref<8x128xf32, #tpu.memory_space<vmem>>, vector<8x128xf32>,
    %c0_i32_16 = arith.constant 0 : i32
    %22 = arith.cmpi eq, %arg1, %c0_i32_16 : i32
    %23 = arith.extui %22 : i1 to i32
    %c0_i32_17 = arith.constant 0 : i32
    %24 = arith.cmpi ne, %23, %c0_i32_17 : i32
    scf.if %24 {
      %c0_18 = arith.constant 0 : index
      %c0_19 = arith.constant 0 : index
      %25 = vector.load %arg8[%c0_18, %c0_19] : memref<8x128xf32, #tpu.memory_space<vmem>>, vector<8x128xf32>
      %c0_20 = arith.constant 0 : index
      %c0_21 = arith.constant 0 : index
      %26 = vector.load %arg6[%c0_20, %c0_21] : memref<1x128xf32, #tpu.memory_space<vmem>>, vector<1x128xf32>
      %27 = vector.broadcast %26 : vector<1x128xf32> to vector<8x128xf32>
      %28 = arith.addf %25, %27 : vector<8x128xf32>
      %c0_22 = arith.constant 0 : index
      %c0_23 = arith.constant 0 : index
      %29 = vector.load %arg7[%c0_22, %c0_23] : memref<8x128xf32, #tpu.memory_space<vmem>>, vector<8x128xf32>
      tpu.vector_store %arg7[%c0_22, %c0_23], %28 {strides = array<i32>} : memref<8x128xf32, #tpu.memory_space<vmem>>, vector<8x128xf32>,
    } else {
    }
    return
  }
  func.func @transform_0(%arg0: i32, %arg1: i32) -> (i32, i32) {
    %c0_i32 = arith.constant 0 : i32
    %c0_i32_0 = arith.constant 0 : i32
    return %arg0, %c0_i32 : i32, i32
  }
  func.func @transform_1(%arg0: i32, %arg1: i32) -> (i32, i32) {
    %c0_i32 = arith.constant 0 : i32
    %c0_i32_0 = arith.constant 0 : i32
    return %c0_i32, %arg1 : i32, i32
  }
  func.func @transform_2(%arg0: i32, %arg1: i32) -> (i32, i32) {
    %c0_i32 = arith.constant 0 : i32
    %c0_i32_0 = arith.constant 0 : i32
    return %c0_i32, %arg1 : i32, i32
  }
  func.func @transform_3(%arg0: i32, %arg1: i32) -> (i32, i32) {
    %c0_i32 = arith.constant 0 : i32
    %c0_i32_0 = arith.constant 0 : i32
    return %arg1, %c0_i32 : i32, i32
  }
  func.func @transform_4(%arg0: i32, %arg1: i32) -> (i32, i32) {
    %c0_i32 = arith.constant 0 : i32
    %c0_i32_0 = arith.constant 0 : i32
    %c0_i32_1 = arith.constant 0 : i32
    return %c0_i32, %c0_i32_0 : i32, i32
  }
  func.func @transform_5(%arg0: i32, %arg1: i32) -> (i32, i32) {
    %c0_i32 = arith.constant 0 : i32
    %c0_i32_0 = arith.constant 0 : i32
    return %arg0, %c0_i32 : i32, i32
  }
}

</mosaic_0001>

<bundles_post_ra>
// kernel: tpu_custom_call.1
= control target key start
LH: loop header
LB: loop body
LE: loop exit
PB: predicated region body
PF: predicated region fallthrough
CT: control target
= control target key end

     0   :  { %s1288_s0 = inlined_call_operand.hbm [shape: f32[16,128], index: 0, kind: input, shape index: {}]   ;;  %s1289_s1 = inlined_call_operand.hbm [shape: f32[128,128], index: 1, kind: input, shape index: {}]   ;;  %s1290_s2 = inlined_call_operand.vmem [shape: f32[1,128], index: 2, kind: input, shape index: {}]   ;;  %s1291_s3 = inlined_call_operand.hbm [shape: f32[128,128], index: 3, kind: input, shape index: {}]   ;;  %s1292_s4 = inlined_call_operand.vmem [shape: f32[1,128], index: 4, kind: input, shape index: {}]   ;;  %s1293_s5 = inlined_call_operand.hbm [shape: f32[16,128], index: 5, kind: output, shape index: {}]  }
   0x1   :  { %1297 = sst [smem:[#allocation13_spill]] %s1289_s1 }
   0x2   :  { %10 = vsyncpa [#allocation4], 0 }
   0x3   :  { %12 = vsyncpa [#allocation4 + $0x1], 0 }
   0x4   :  { %13 = vsyncpa [#allocation7], 0 }
   0x5   :  { %14 = vsyncpa [#allocation5], 0 }
   0x6   :  { %16 = vsyncpa [#allocation5 + $0x1], 0  ;;  %s1061_s18 = smov 0   ;;  %s1063_s19 = smov 0  }
   0x7   :  { %s1065_s20 = smov 0   ;;  %s1067_s21 = smov 0  }
   0x8   :  { %s1069_s22 = smov 0   ;;  %s1071_s23 = smov 0  }
   0x9 LB: > { %s644_s24 = sadd.s32 4294967295, %s1021_s23   ;;  %s645_s25 = sadd.s32 4294967294, %s1021_s23   ;;  %s1021_s23 = sphi %s1071_s23, %s22_s23   ;;  %s1017_s22 = sphi %s1069_s22, %s1315_s22   ;;  %s1013_s21 = sphi %s1067_s21, %s1314_s21   ;;  %s1009_s20 = sphi %s1065_s20, %s1313_s20   ;;  %s1005_s19 = sphi %s1063_s19, %s1312_s19   ;;  %s1001_s18 = sphi %s1061_s18, %s1311_s18  }
   0xa   : > { %p54_p0 = scmp.ne.s32.totalorder %s1005_s19, %s1001_s18  ;;  %p1095_p1 = scmp.eq.s32.totalorder %s644_s24, 0 }
   0xb   : > { %p1099_p2 = scmp.eq.s32.totalorder %s644_s24, 1  ;;  %p183_p3 = scmp.eq.s32.totalorder %s645_s25, 1 }
   0xc   : > { %s1298_s26 = scalar_select %p1095_p1, 1, 0 }
   0xd   : > { %p1105_p4 = por %p1095_p1, %p54_p0  ;;  %p646_p5 = scmp.ge.s32.totalorder %s1021_s23, 1 }
   0xe   : > { %p1110_p6 = por %p183_p3, %p54_p0  ;;  %p190_p7 = scmp.lt.s32.totalorder %s1021_s23, 3 }
   0xf   : > { %s1300_s28 = scalar_select %p1105_p4, 1, 0 }
  0x10   : > { %s1301_s29 = scalar_select %p1110_p6, 1, 0 }
  0x11   : > { %p1115_p8 = pnand %p646_p5, %p190_p7  ;;  %s1023_s6 = smov [#allocation6]  }
  0x12   : > { %s204_s7 = sshll.u32 %s1023_s6, 4  ;;  %s1024_s9 = smov [#allocation8]   ;;  %s205_s7 = int_to_ptr.vmem [resolvable:$true] %s204_s7 }
  0x13   : > { %p780_p9 = pneg %p1115_p8  ;;  %s226_s10 = sshll.u32 %s1024_s9, 4  ;;  %s227_s10 = int_to_ptr.vmem [resolvable:$true] %s226_s10 }
  0x14   : > { %s868_s11 = scalar_lea.vmem %s205_s7, 2048  ;;  %p876_p5 = scmp.lt.s32.totalorder %s205_s7, %s205_s7 }
  0x15   : > { %p1124_p11 = pnand %p780_p9, %p1095_p1  ;;  %p869_p13 = scmp.ne.s32.totalorder %s205_s7, %s868_s11 }
  0x16   : > { %p877_p7 = scmp.lt.s32.totalorder %s868_s11, %s868_s11 }
  0x17   : > { %p859_p12 = pneg %p1124_p11 }
  0x18   : > { %p878_p10 = por %p877_p7, %p876_p5 }
  0x19   : > { %p871_p0 = pnand %p869_p13, %p859_p12 }
  0x1b   : > { %p872_p3 = pneg %p871_p0 }
  0x1d   : > { %p879_p9 = pnand %p878_p10, %p872_p3 }
  0x1f   : > { %882 = shalt.err (!%p879_p9)
}
  0x20   : > { %s1025_s12 = smov 128   ;;  %s1026_s13 = smov 8  }
  0x21   : > { %s1304_s1 = sld [smem:[#allocation13_spill]]  ;;  %s894_s16 = scalar_lea.vmem %s227_s10, 2048 }
  0x22   : > { %p895_p6 = scmp.ne.s32.totalorder %s227_s10, %s894_s16  ;;  %p902_p1 = scmp.lt.s32.totalorder %s227_s10, %s227_s10 }
  0x23   : > { %p903_p4 = scmp.lt.s32.totalorder %s894_s16, %s894_s16 }
  0x24   : > { %p897_p13 = pnand %p895_p6, %p859_p12 }
  0x25   : > { %p904_p5 = por %p903_p4, %p902_p1 }
  0x26   : > { %p898_p0 = pneg %p897_p13 }
  0x27   : > { %783 = dma.hbm_to_vmem [thread:$0]  (!%p1124_p11), %s1304_s1, 2048, %s205_s7, [#allocation7], %s1025_s12, %s1025_s12, %s1026_s13  }
  0x28   : > { %p905_p10 = pnand %p904_p5, %p898_p0 }
  0x2a   : > { %908 = shalt.err (!%p905_p10)
}
  0x2b   : > { %786 = dma.hbm_to_vmem [thread:$0]  (!%p1124_p11), %s1291_s3, 2048, %s227_s10, [#allocation7], %s1025_s12, %s1025_s12, %s1026_s13  }
  0x2c   : > { %s34_s25 = sadd.s32 1, %s1017_s22  ;;  %s41_s6 = sadd.s32 1, %s1009_s20 }
  0x2d   : > { %p36_p1 = scmp.ge.s32.totalorder %s34_s25, 2  ;;  %p48_p4 = scmp.ne.s32.totalorder %s1009_s20, %s1005_s19 }
  0x2e   : > { %p49_p6 = scmp.eq.s32.totalorder %s1021_s23, 0  ;;  %p797_p12 = scmp.lt.s32.totalorder %s1021_s23, 2 }
  0x2f   : > { %s1317_s25 = smov (%p36_p1, %s34_s25), 0  ;;  %p1156_p7 = por %p1099_p2, %p48_p4 }
  0x30   : > { %p50_p3 = por %p49_p6, %p48_p4  ;;  %s38_s8 = ssub.s32 %s1017_s22, %s1317_s25 }
  0x31   : > { %s243_s9 = sand.u32 1, %s1009_s20   ;;  %p39_p9 = scmp.eq.s32.totalorder %s38_s8, 0 }
  0x32   : > { %s651_s10 = sshll.u32 %s243_s9, 3  ;;  %s652_s11 = sshll.u32 %s1017_s22, 7 }
  0x33   : > { %s1165_s12 = scalar_select %p39_p9, %s1009_s20, %s41_s6  }
  0x34   : > { %s252_s15 = scalar_lea.hbm %s1288_s0, %s652_s11  ;;  %s247_s16 = scalar_lea.vmem [#allocation3], %s651_s10 }
  0x35   : > { %s254_s17 = sshll.u32 %s247_s16, 4  ;;  %p1172_p11 = pnand %p797_p12, %p50_p3  ;;  %s255_s17 = int_to_ptr.vmem [resolvable:$true] %s254_s17 }
  0x36   : > { %s244_s24 = scalar_lea.sflag [#allocation4], %s243_s9  ;;  %s922_s8 = scalar_lea.vmem %s255_s17, 128 }
  0x37   : > { %p911_p2 = pneg %p1172_p11  ;;  %p923_p13 = scmp.ne.s32.totalorder %s255_s17, %s922_s8 }
  0x38   : > { %s1027_s6 = smov [#allocation3]  }
  0x39   : > { %p925_p0 = pnand %p923_p13, %p911_p2  ;;  %s927_s1 = sshll.u32 %s1027_s6, 4  ;;  %s928_s1 = int_to_ptr.vmem [resolvable:$false] %s927_s1 }
  0x3a   : > { %s929_s11 = scalar_lea.vmem %s928_s1, 256  ;;  %p930_p10 = scmp.lt.s32.totalorder %s255_s17, %s928_s1 }
  0x3b   : > { %p926_p5 = pneg %p925_p0  ;;  %p931_p1 = scmp.lt.s32.totalorder %s929_s11, %s922_s8 }
  0x3d   : > { %p932_p4 = por %p931_p1, %p930_p10 }
  0x3f   : > { %p933_p6 = pnand %p932_p4, %p926_p5 }
  0x41   : > { %936 = shalt.err (!%p933_p6)
}
  0x42   : > { %790 = dma.hbm_to_vmem [thread:$0]  (!%p1172_p11), %s252_s15, 128, %s255_s17, %s244_s24  }
  0x43   : > { %263 = sbr.rel (%p1115_p8) target bundleno = 533 (0x215), region = 40  ;;  %s1183_s9 = sand.u32 (!%p1115_p8), 1, %s1005_s19  }
  0x44   : > { %s654_s10 = sshll.u32 (!%p1115_p8), %s1183_s9, 3  ;;  %s266_s13 = scalar_lea.sflag (!%p1115_p8), [#allocation4], %s1183_s9 }
  0x45   : > { %s1189_s1 = scalar_lea.vmem (!%p1115_p8), [#allocation3], %s654_s10  ;;  %p1307_p12 = scmp.ne.s32.totalorder (!%p1115_p8), %s1300_s28, 0 }
  0x48   : > { %988 = dma.done.wait (%p1307_p12), %s266_s13, 128  }
  0x49   : > { %990 = vsyncadd (%p1307_p12), %s266_s13, 4294967168  ;;  %p1308_p3 = scmp.ne.s32.totalorder %s1298_s26, 0 }
  0x4b   : > { %992 = dma.done.wait (%p1308_p3), [#allocation7], 4096  }
  0x4c   : > { %994 = vsyncadd (%p1308_p3), [#allocation7], 4294963200  ;;  %v1028_v0 = vmov 0.0   ;;  %vm1029_vm0 = vmmov 0   ;;  %v332_v1 = vld [vmem:[#allocation6 + $0x78] sm:$0xff]  ;;  %v331_v2 = vld [vmem:[#allocation6 + $0x70] sm:$0xff] }
  0x4d   : > { %698 = vmatprep.subr.mxu0 %v1028_v0  ;;  %730 = vmatprep.mubr.msk.f32.mxu0 %vm1029_vm0, %v1028_v0  ;;  %v330_v3 = vld [vmem:[#allocation6 + $0x68] sm:$0xff]  ;;  %v329_v4 = vld [vmem:[#allocation6 + $0x60] sm:$0xff]  ;;  %v431_v5 = vld [vmem:[#allocation8 + $0x78] sm:$0xff]  ;;  %s661_s15 = sshll.u32 %s1013_s21, 7  ;;  %s306_s16 = scalar_lea.vmem [#allocation9], %s654_s10 }
  0x4e   : > { %733 = vmatprep.subr.mxu1 %v1028_v0  ;;  %765 = vmatprep.mubr.msk.f32.mxu1 %vm1029_vm0, %v1028_v0  ;;  %v328_v6 = vld [vmem:[#allocation6 + $0x58] sm:$0xff]  ;;  %v430_v7 = vld [vmem:[#allocation8 + $0x70] sm:$0xff]  ;;  %v429_v8 = vld [vmem:[#allocation8 + $0x68] sm:$0xff]  ;;  %s531_s17 = sshll.u32 %s306_s16, 4  ;;  %s1246_s8 = scalar_lea.hbm %s1293_s5, %s661_s15  ;;  %s532_s17 = int_to_ptr.vmem [resolvable:$true] %s531_s17 }
  0x4f   : > { %699 = vmatpush3.msra.mxu0 %v332_v1  ;;  %734 = vmatpush3.msra.mxu1 %v431_v5  ;;  %v327_v9 = vld [vmem:[#allocation6 + $0x50] sm:$0xff]  ;;  %v428_v10 = vld [vmem:[#allocation8 + $0x60] sm:$0xff]  ;;  %v326_v11 = vld [vmem:[#allocation6 + $0x48] sm:$0xff]  ;;  %s518_s6 = scalar_lea.sflag [#allocation5], %s1183_s9  ;;  %s937_s11 = scalar_lea.vmem %s532_s17, 128 }
  0x50   : > { %700 = vmatprep.subr.mxu0 %v1028_v0  ;;  %735 = vmatprep.subr.mxu1 %v1028_v0  ;;  %v325_v12 = vld [vmem:[#allocation6 + $0x40] sm:$0xff]  ;;  %v324_v13 = vld [vmem:[#allocation6 + $0x38] sm:$0xff]  ;;  %v323_v14 = vld [vmem:[#allocation6 + $0x30] sm:$0xff]  ;;  %p938_p8 = scmp.ne.s32.totalorder %s532_s17, %s937_s11  ;;  %s1030_s21 = smov [#allocation9]  }
  0x51   : > { %701 = vmatpush3.msra.mxu0 %v331_v2  ;;  %736 = vmatpush3.msra.mxu1 %v430_v7  ;;  %v322_v15 = vld [vmem:[#allocation6 + $0x28] sm:$0xff]  ;;  %v321_v16 = vld [vmem:[#allocation6 + $0x20] sm:$0xff]  ;;  %v320_v17 = vld [vmem:[#allocation6 + $0x18] sm:$0xff]  ;;  %s941_s13 = sshll.u32 %s1030_s21, 4  ;;  %s942_s13 = int_to_ptr.vmem [resolvable:$false] %s941_s13 }
  0x52   : > { %702 = vmatprep.subr.mxu0 %v1028_v0  ;;  %737 = vmatprep.subr.mxu1 %v1028_v0  ;;  %v319_v18 = vld [vmem:[#allocation6 + $0x10] sm:$0xff]  ;;  %v318_v19 = vld [vmem:[#allocation6 + $0x8] sm:$0xff]  ;;  %v317_v20 = vld [vmem:[#allocation6] sm:$0xff]  ;;  %p939_p9 = pnand %p938_p8, %p1156_p7  ;;  %s943_s10 = scalar_lea.vmem %s942_s13, 256 }
  0x53   : > { %703 = vmatpush3.msra.mxu0 %v330_v3  ;;  %738 = vmatpush3.msra.mxu1 %v429_v8  ;;  %v316_v21 = vld [vmem:[%s1189_s1] sm:$0xff]  ;;  %v425_v24 = vld [vmem:[#allocation8 + $0x48] sm:$0xff]  ;;  %v424_v25 = vld [vmem:[#allocation8 + $0x40] sm:$0xff]  ;;  %p944_p2 = scmp.lt.s32.totalorder %s532_s17, %s942_s13  ;;  %p945_p13 = scmp.lt.s32.totalorder %s943_s10, %s937_s11 }
  0x54   : > { %704 = vmatprep.subr.mxu0 %v1028_v0  ;;  %739 = vmatprep.subr.mxu1 %v1028_v0  ;;  %v427_v22 = vld [vmem:[#allocation8 + $0x58] sm:$0xff]  ;;  %v426_v23 = vld [vmem:[#allocation8 + $0x50] sm:$0xff]  ;;  %v421_v28 = vld [vmem:[#allocation8 + $0x28] sm:$0xff]  ;;  %p940_p11 = pneg %p939_p9 }
  0x55   : > { %705 = vmatpush3.msra.mxu0 %v329_v4  ;;  %740 = vmatpush3.msra.mxu1 %v428_v10  ;;  %v423_v26 = vld [vmem:[#allocation8 + $0x38] sm:$0xff]  ;;  %v422_v27 = vld [vmem:[#allocation8 + $0x30] sm:$0xff]  ;;  %v420_v29 = vld [vmem:[#allocation8 + $0x20] sm:$0xff]  ;;  %p946_p0 = por %p945_p13, %p944_p2 }
  0x56   : > { %706 = vmatprep.subr.mxu0 %v1028_v0  ;;  %741 = vmatprep.subr.mxu1 %v1028_v0  ;;  %v419_v30 = vld [vmem:[#allocation8 + $0x18] sm:$0xff]  ;;  %v418_v31 = vld [vmem:[#allocation8 + $0x10] sm:$0xff]  ;;  %v417_v32 = vld [vmem:[#allocation8 + $0x8] sm:$0xff] }
  0x57   : > { %707 = vmatpush3.msra.mxu0 %v328_v6  ;;  %742 = vmatpush3.msra.mxu1 %v427_v22  ;;  %v416_v33 = vld [vmem:[#allocation8] sm:$0xff]  ;;  %v658_v34 = vld [vmem:[%s1290_s2] ss:$0 sm:$0xff]  ;;  %p947_p5 = pnand %p946_p0, %p940_p11 }
  0x58   : > { %708 = vmatprep.subr.mxu0 %v1028_v0  ;;  %743 = vmatprep.subr.mxu1 %v1028_v0  ;;  %v659_v43 = vld [vmem:[%s1292_s4] ss:$0 sm:$0xff] }
  0x59   : > { %709 = vmatpush3.msra.mxu0 %v327_v9  ;;  %744 = vmatpush3.msra.mxu1 %v426_v23 }
  0x5a   : > { %710 = vmatprep.subr.mxu0 %v1028_v0  ;;  %745 = vmatprep.subr.mxu1 %v1028_v0 }
  0x5b   : > { %711 = vmatpush3.msra.mxu0 %v326_v11  ;;  %746 = vmatpush3.msra.mxu1 %v425_v24 }
  0x5c   : > { %712 = vmatprep.subr.mxu0 %v1028_v0  ;;  %747 = vmatprep.subr.mxu1 %v1028_v0 }
  0x5d   : > { %713 = vmatpush3.msra.mxu0 %v325_v12  ;;  %748 = vmatpush3.msra.mxu1 %v424_v25 }
  0x5e   : > { %714 = vmatprep.subr.mxu0 %v1028_v0  ;;  %749 = vmatprep.subr.mxu1 %v1028_v0 }
  0x5f   : > { %715 = vmatpush3.msra.mxu0 %v324_v13  ;;  %750 = vmatpush3.msra.mxu1 %v423_v26 }
  0x60   : > { %716 = vmatprep.subr.mxu0 %v1028_v0  ;;  %751 = vmatprep.subr.mxu1 %v1028_v0 }
  0x61   : > { %717 = vmatpush3.msra.mxu0 %v323_v14  ;;  %752 = vmatpush3.msra.mxu1 %v422_v27 }
  0x62   : > { %718 = vmatprep.subr.mxu0 %v1028_v0  ;;  %753 = vmatprep.subr.mxu1 %v1028_v0 }
  0x63   : > { %719 = vmatpush3.msra.mxu0 %v322_v15  ;;  %754 = vmatpush3.msra.mxu1 %v421_v28 }
  0x64   : > { %720 = vmatprep.subr.mxu0 %v1028_v0  ;;  %755 = vmatprep.subr.mxu1 %v1028_v0 }
  0x65   : > { %721 = vmatpush3.msra.mxu0 %v321_v16  ;;  %756 = vmatpush3.msra.mxu1 %v420_v29 }
  0x66   : > { %722 = vmatprep.subr.mxu0 %v1028_v0  ;;  %757 = vmatprep.subr.mxu1 %v1028_v0 }
  0x67   : > { %723 = vmatpush3.msra.mxu0 %v320_v17  ;;  %758 = vmatpush3.msra.mxu1 %v419_v30 }
  0x68   : > { %724 = vmatprep.subr.mxu0 %v1028_v0  ;;  %759 = vmatprep.subr.mxu1 %v1028_v0 }
  0x69   : > { %725 = vmatpush3.msra.mxu0 %v319_v18  ;;  %760 = vmatpush3.msra.mxu1 %v418_v31 }
  0x6a   : > { %726 = vmatprep.subr.mxu0 %v1028_v0  ;;  %761 = vmatprep.subr.mxu1 %v1028_v0 }
  0x6b   : > { %727 = vmatpush3.msra.mxu0 %v318_v19  ;;  %762 = vmatpush3.msra.mxu1 %v417_v32 }
  0x6c   : > { %728 = vmatprep.subr.mxu0 %v1028_v0  ;;  %763 = vmatprep.subr.mxu1 %v1028_v0 }
  0x6d   : > { %729 = vmatpush3.msra.mxu0 %v317_v20  ;;  %764 = vmatpush3.msra.mxu1 %v416_v33 }
  0x6e   : > { %731 = vmatmul.mubr.f32.vlgmr.msra.gmra.mxu0 %v316_v21 }
 0x12e   : > { %v406_v35 = vpop.f32.mrf.mxu0 }
 0x12f   : > { %v407_v36 = vadd.f32 %v658_v34, %v406_v35 }
 0x130   : > { %v732_v37 = vpop.f32.mrf.mxu0 }
 0x131   : > { %v411_v38 = vmul.f32 0.70710677, %v407_v36  ;;  %v410_v40 = vmul.f32 0.5, %v407_v36 }
 0x133   : > { %855 = verf.f32 %v411_v38 }
 0x140   : > { %v856_v39 = vpop.eup %855 }
 0x141   : > { %v413_v41 = vadd.f32 1.0, %v856_v39 }
 0x143   : > { %v414_v42 = vmul.f32 %v413_v41, %v410_v40 }
 0x145   : > { %766 = vmatmul.mubr.f32.vlgmr.msra.gmra.mxu1 %v414_v42 }
 0x205   : > { %v498_v44 = vpop.f32.mrf.mxu1 }
 0x206   : > { %v515_v45 = vadd.f32 %v659_v43, %v498_v44 }
 0x207   : > { %v767_v46 = vpop.f32.mrf.mxu1 }
 0x208   : > { %516 = vst [vmem:[%s306_s16] sm:$0xff] %v515_v45 }
 0x209   : > { %950 = shalt.err (!%p947_p5)
}
 0x20a   : > { %s951_s1 = scalar_lea.hbm %s1246_s8, 128  ;;  %s955_s28 = scalar_lea.hbm %s1293_s5, 256 }
 0x20b   : > { %p952_p10 = scmp.ne.s32.totalorder %s1246_s8, %s951_s1  ;;  %p956_p6 = scmp.lt.s32.totalorder %s1246_s8, %s1293_s5 }
 0x20c   : > { %p957_p12 = scmp.lt.s32.totalorder %s955_s28, %s951_s1 }
 0x20d   : > { %p953_p1 = pnand %p952_p10, %p1156_p7 }
 0x20e   : > { %p958_p3 = por %p957_p12, %p956_p6 }
 0x20f   : > { %p954_p4 = pneg %p953_p1 }
 0x211   : > { %p959_p8 = pnand %p958_p3, %p954_p4 }
 0x213   : > { %962 = shalt.err (!%p959_p8)
}
 0x214   : > { %778 = dma.vmem_to_hbm [thread:$0]  (%p1156_p7), %s532_s17, 128, %s1246_s8, %s518_s6  }
 0x215 PF: > { %s543_s15 = sand.u32 1, %s1001_s18   ;;  %p1309_p9 = scmp.ne.s32.totalorder %s1301_s29, 0 }
 0x216   : > { %p1310_p11 = scmp.ge.s32.totalorder %s1021_s23, 2  ;;  %s544_s16 = scalar_lea.sflag [#allocation5], %s543_s15 }
 0x218   : > { %p792_p2 = pnand %p1310_p11, %p1309_p9 }
 0x21a   : > { %p793_p13 = pneg %p792_p2 }
 0x21c   : > { %996 = dma.done.wait (%p793_p13), %s544_s16, 128  }
 0x21d   : > { %998 = vsyncadd (%p793_p13), %s544_s16, 4294967168  ;;  %s22_s23 = sadd.s32 1, %s1021_s23   ;;  %s1311_s18 = smov %s1005_s19 }
 0x21e   : > { %p19_p0 = scmp.ge.s32.totalorder %s22_s23, 4   ;;  %s1312_s19 = smov %s1009_s20 }
 0x21f   : > { %s1313_s20 = smov %s1165_s12  ;;  %s1314_s21 = smov %s1017_s22 }
 0x220   : > { %s1315_s22 = smov %s1317_s25  ;;  %21 = sbr.rel (!%p19_p0) target bundleno = 9 (0x9), region = 106 }
 0x225   :  { %549 = vsyncpa [#allocation4], 1 }
 0x226   :  { %551 = vsyncpa [#allocation4 + $0x1], 1 }
 0x227   :  { %552 = vsyncpa [#allocation7], 1 }
 0x228   :  { %553 = vsyncpa [#allocation5], 1 }
 0x229   :  { %555 = vsyncpa [#allocation5 + $0x1], 1 }

// kernel: tpu_custom_call.1
= control target key start
LH: loop header
LB: loop body
LE: loop exit
PB: predicated region body
PF: predicated region fallthrough
CT: control target
= control target key end

     0   :  { %s1288_s0 = inlined_call_operand.hbm [shape: f32[16,128], index: 0, kind: input, shape index: {}]   ;;  %s1289_s1 = inlined_call_operand.hbm [shape: f32[128,128], index: 1, kind: input, shape index: {}]   ;;  %s1290_s2 = inlined_call_operand.vmem [shape: f32[1,128], index: 2, kind: input, shape index: {}]   ;;  %s1291_s3 = inlined_call_operand.hbm [shape: f32[128,128], index: 3, kind: input, shape index: {}]   ;;  %s1292_s4 = inlined_call_operand.vmem [shape: f32[1,128], index: 4, kind: input, shape index: {}]   ;;  %s1293_s5 = inlined_call_operand.hbm [shape: f32[16,128], index: 5, kind: output, shape index: {}]  }
   0x1   :  { %1297 = sst [smem:[#allocation13_spill]] %s1289_s1 }
   0x2   :  { %10 = vsyncpa [#allocation4], 0 }
   0x3   :  { %12 = vsyncpa [#allocation4 + $0x1], 0 }
   0x4   :  { %13 = vsyncpa [#allocation7], 0 }
   0x5   :  { %14 = vsyncpa [#allocation5], 0 }
   0x6   :  { %16 = vsyncpa [#allocation5 + $0x1], 0  ;;  %s1061_s18 = smov 0   ;;  %s1063_s19 = smov 0  }
   0x7   :  { %s1065_s20 = smov 0   ;;  %s1067_s21 = smov 0  }
   0x8   :  { %s1069_s22 = smov 0   ;;  %s1071_s23 = smov 0  }
   0x9 LB: > { %s644_s24 = sadd.s32 4294967295, %s1021_s23   ;;  %s645_s25 = sadd.s32 4294967294, %s1021_s23   ;;  %s1021_s23 = sphi %s1071_s23, %s22_s23   ;;  %s1017_s22 = sphi %s1069_s22, %s1315_s22   ;;  %s1013_s21 = sphi %s1067_s21, %s1314_s21   ;;  %s1009_s20 = sphi %s1065_s20, %s1313_s20   ;;  %s1005_s19 = sphi %s1063_s19, %s1312_s19   ;;  %s1001_s18 = sphi %s1061_s18, %s1311_s18  }
   0xa   : > { %p54_p0 = scmp.ne.s32.totalorder %s1005_s19, %s1001_s18  ;;  %p1095_p1 = scmp.eq.s32.totalorder %s644_s24, 0 }
   0xb   : > { %p1099_p2 = scmp.eq.s32.totalorder %s644_s24, 1  ;;  %p183_p3 = scmp.eq.s32.totalorder %s645_s25, 1 }
   0xc   : > { %s1298_s26 = scalar_select %p1095_p1, 1, 0 }
   0xd   : > { %p1105_p4 = por %p1095_p1, %p54_p0  ;;  %p646_p5 = scmp.ge.s32.totalorder %s1021_s23, 1 }
   0xe   : > { %p1110_p6 = por %p183_p3, %p54_p0  ;;  %p190_p7 = scmp.lt.s32.totalorder %s1021_s23, 3 }
   0xf   : > { %s1300_s28 = scalar_select %p1105_p4, 1, 0 }
  0x10   : > { %s1301_s29 = scalar_select %p1110_p6, 1, 0 }
  0x11   : > { %p1115_p8 = pnand %p646_p5, %p190_p7  ;;  %s1023_s6 = smov [#allocation6]  }
  0x12   : > { %s204_s7 = sshll.u32 %s1023_s6, 4  ;;  %s1024_s9 = smov [#allocation8]   ;;  %s205_s7 = int_to_ptr.vmem [resolvable:$true] %s204_s7 }
  0x13   : > { %p780_p9 = pneg %p1115_p8  ;;  %s226_s10 = sshll.u32 %s1024_s9, 4  ;;  %s227_s10 = int_to_ptr.vmem [resolvable:$true] %s226_s10 }
  0x14   : > { %s868_s11 = scalar_lea.vmem %s205_s7, 2048  ;;  %p876_p5 = scmp.lt.s32.totalorder %s205_s7, %s205_s7 }
  0x15   : > { %p1124_p11 = pnand %p780_p9, %p1095_p1  ;;  %p869_p13 = scmp.ne.s32.totalorder %s205_s7, %s868_s11 }
  0x16   : > { %p877_p7 = scmp.lt.s32.totalorder %s868_s11, %s868_s11 }
  0x17   : > { %p859_p12 = pneg %p1124_p11 }
  0x18   : > { %p878_p10 = por %p877_p7, %p876_p5 }
  0x19   : > { %p871_p0 = pnand %p869_p13, %p859_p12 }
  0x1b   : > { %p872_p3 = pneg %p871_p0 }
  0x1d   : > { %p879_p9 = pnand %p878_p10, %p872_p3 }
  0x1f   : > { %882 = shalt.err (!%p879_p9)
}
  0x20   : > { %s1025_s12 = smov 128   ;;  %s1026_s13 = smov 8  }
  0x21   : > { %s1304_s1 = sld [smem:[#allocation13_spill]]  ;;  %s894_s16 = scalar_lea.vmem %s227_s10, 2048 }
  0x22   : > { %p895_p6 = scmp.ne.s32.totalorder %s227_s10, %s894_s16  ;;  %p902_p1 = scmp.lt.s32.totalorder %s227_s10, %s227_s10 }
  0x23   : > { %p903_p4 = scmp.lt.s32.totalorder %s894_s16, %s894_s16 }
  0x24   : > { %p897_p13 = pnand %p895_p6, %p859_p12 }
  0x25   : > { %p904_p5 = por %p903_p4, %p902_p1 }
  0x26   : > { %p898_p0 = pneg %p897_p13 }
  0x27   : > { %783 = dma.hbm_to_vmem [thread:$0]  (!%p1124_p11), %s1304_s1, 2048, %s205_s7, [#allocation7], %s1025_s12, %s1025_s12, %s1026_s13  }
  0x28   : > { %p905_p10 = pnand %p904_p5, %p898_p0 }
  0x2a   : > { %908 = shalt.err (!%p905_p10)
}
  0x2b   : > { %786 = dma.hbm_to_vmem [thread:$0]  (!%p1124_p11), %s1291_s3, 2048, %s227_s10, [#allocation7], %s1025_s12, %s1025_s12, %s1026_s13  }
  0x2c   : > { %s34_s25 = sadd.s32 1, %s1017_s22  ;;  %s41_s6 = sadd.s32 1, %s1009_s20 }
  0x2d   : > { %p36_p1 = scmp.ge.s32.totalorder %s34_s25, 2  ;;  %p48_p4 = scmp.ne.s32.totalorder %s1009_s20, %s1005_s19 }
  0x2e   : > { %p49_p6 = scmp.eq.s32.totalorder %s1021_s23, 0  ;;  %p797_p12 = scmp.lt.s32.totalorder %s1021_s23, 2 }
  0x2f   : > { %s1317_s25 = smov (%p36_p1, %s34_s25), 0  ;;  %p1156_p7 = por %p1099_p2, %p48_p4 }
  0x30   : > { %p50_p3 = por %p49_p6, %p48_p4  ;;  %s38_s8 = ssub.s32 %s1017_s22, %s1317_s25 }
  0x31   : > { %s243_s9 = sand.u32 1, %s1009_s20   ;;  %p39_p9 = scmp.eq.s32.totalorder %s38_s8, 0 }
  0x32   : > { %s651_s10 = sshll.u32 %s243_s9, 3  ;;  %s652_s11 = sshll.u32 %s1017_s22, 7 }
  0x33   : > { %s1165_s12 = scalar_select %p39_p9, %s1009_s20, %s41_s6  }
  0x34   : > { %s252_s15 = scalar_lea.hbm %s1288_s0, %s652_s11  ;;  %s247_s16 = scalar_lea.vmem [#allocation3], %s651_s10 }
  0x35   : > { %s254_s17 = sshll.u32 %s247_s16, 4  ;;  %p1172_p11 = pnand %p797_p12, %p50_p3  ;;  %s255_s17 = int_to_ptr.vmem [resolvable:$true] %s254_s17 }
  0x36   : > { %s244_s24 = scalar_lea.sflag [#allocation4], %s243_s9  ;;  %s922_s8 = scalar_lea.vmem %s255_s17, 128 }
  0x37   : > { %p911_p2 = pneg %p1172_p11  ;;  %p923_p13 = scmp.ne.s32.totalorder %s255_s17, %s922_s8 }
  0x38   : > { %s1027_s6 = smov [#allocation3]  }
  0x39   : > { %p925_p0 = pnand %p923_p13, %p911_p2  ;;  %s927_s1 = sshll.u32 %s1027_s6, 4  ;;  %s928_s1 = int_to_ptr.vmem [resolvable:$false] %s927_s1 }
  0x3a   : > { %s929_s11 = scalar_lea.vmem %s928_s1, 256  ;;  %p930_p10 = scmp.lt.s32.totalorder %s255_s17, %s928_s1 }
  0x3b   : > { %p926_p5 = pneg %p925_p0  ;;  %p931_p1 = scmp.lt.s32.totalorder %s929_s11, %s922_s8 }
  0x3d   : > { %p932_p4 = por %p931_p1, %p930_p10 }
  0x3f   : > { %p933_p6 = pnand %p932_p4, %p926_p5 }
  0x41   : > { %936 = shalt.err (!%p933_p6)
}
  0x42   : > { %790 = dma.hbm_to_vmem [thread:$0]  (!%p1172_p11), %s252_s15, 128, %s255_s17, %s244_s24  }
  0x43   : > { %263 = sbr.rel (%p1115_p8) target bundleno = 533 (0x215), region = 40  ;;  %s1183_s9 = sand.u32 (!%p1115_p8), 1, %s1005_s19  }
  0x44   : > { %s654_s10 = sshll.u32 (!%p1115_p8), %s1183_s9, 3  ;;  %s266_s13 = scalar_lea.sflag (!%p1115_p8), [#allocation4], %s1183_s9 }
  0x45   : > { %s1189_s1 = scalar_lea.vmem (!%p1115_p8), [#allocation3], %s654_s10  ;;  %p1307_p12 = scmp.ne.s32.totalorder (!%p1115_p8), %s1300_s28, 0 }
  0x48   : > { %988 = dma.done.wait (%p1307_p12), %s266_s13, 128  }
  0x49   : > { %990 = vsyncadd (%p1307_p12), %s266_s13, 4294967168  ;;  %p1308_p3 = scmp.ne.s32.totalorder %s1298_s26, 0 }
  0x4b   : > { %992 = dma.done.wait (%p1308_p3), [#allocation7], 4096  }
  0x4c   : > { %994 = vsyncadd (%p1308_p3), [#allocation7], 4294963200  ;;  %v1028_v0 = vmov 0.0   ;;  %vm1029_vm0 = vmmov 0   ;;  %v332_v1 = vld [vmem:[#allocation6 + $0x78] sm:$0xff]  ;;  %v331_v2 = vld [vmem:[#allocation6 + $0x70] sm:$0xff] }
  0x4d   : > { %698 = vmatprep.subr.mxu0 %v1028_v0  ;;  %730 = vmatprep.mubr.msk.f32.mxu0 %vm1029_vm0, %v1028_v0  ;;  %v330_v3 = vld [vmem:[#allocation6 + $0x68] sm:$0xff]  ;;  %v329_v4 = vld [vmem:[#allocation6 + $0x60] sm:$0xff]  ;;  %v431_v5 = vld [vmem:[#allocation8 + $0x78] sm:$0xff]  ;;  %s661_s15 = sshll.u32 %s1013_s21, 7  ;;  %s306_s16 = scalar_lea.vmem [#allocation9], %s654_s10 }
  0x4e   : > { %733 = vmatprep.subr.mxu1 %v1028_v0  ;;  %765 = vmatprep.mubr.msk.f32.mxu1 %vm1029_vm0, %v1028_v0  ;;  %v328_v6 = vld [vmem:[#allocation6 + $0x58] sm:$0xff]  ;;  %v430_v7 = vld [vmem:[#allocation8 + $0x70] sm:$0xff]  ;;  %v429_v8 = vld [vmem:[#allocation8 + $0x68] sm:$0xff]  ;;  %s531_s17 = sshll.u32 %s306_s16, 4  ;;  %s1246_s8 = scalar_lea.hbm %s1293_s5, %s661_s15  ;;  %s532_s17 = int_to_ptr.vmem [resolvable:$true] %s531_s17 }
  0x4f   : > { %699 = vmatpush3.msra.mxu0 %v332_v1  ;;  %734 = vmatpush3.msra.mxu1 %v431_v5  ;;  %v327_v9 = vld [vmem:[#allocation6 + $0x50] sm:$0xff]  ;;  %v428_v10 = vld [vmem:[#allocation8 + $0x60] sm:$0xff]  ;;  %v326_v11 = vld [vmem:[#allocation6 + $0x48] sm:$0xff]  ;;  %s518_s6 = scalar_lea.sflag [#allocation5], %s1183_s9  ;;  %s937_s11 = scalar_lea.vmem %s532_s17, 128 }
  0x50   : > { %700 = vmatprep.subr.mxu0 %v1028_v0  ;;  %735 = vmatprep.subr.mxu1 %v1028_v0  ;;  %v325_v12 = vld [vmem:[#allocation6 + $0x40] sm:$0xff]  ;;  %v324_v13 = vld [vmem:[#allocation6 + $0x38] sm:$0xff]  ;;  %v323_v14 = vld [vmem:[#allocation6 + $0x30] sm:$0xff]  ;;  %p938_p8 = scmp.ne.s32.totalorder %s532_s17, %s937_s11  ;;  %s1030_s21 = smov [#allocation9]  }
  0x51   : > { %701 = vmatpush3.msra.mxu0 %v331_v2  ;;  %736 = vmatpush3.msra.mxu1 %v430_v7  ;;  %v322_v15 = vld [vmem:[#allocation6 + $0x28] sm:$0xff]  ;;  %v321_v16 = vld [vmem:[#allocation6 + $0x20] sm:$0xff]  ;;  %v320_v17 = vld [vmem:[#allocation6 + $0x18] sm:$0xff]  ;;  %s941_s13 = sshll.u32 %s1030_s21, 4  ;;  %s942_s13 = int_to_ptr.vmem [resolvable:$false] %s941_s13 }
  0x52   : > { %702 = vmatprep.subr.mxu0 %v1028_v0  ;;  %737 = vmatprep.subr.mxu1 %v1028_v0  ;;  %v319_v18 = vld [vmem:[#allocation6 + $0x10] sm:$0xff]  ;;  %v318_v19 = vld [vmem:[#allocation6 + $0x8] sm:$0xff]  ;;  %v317_v20 = vld [vmem:[#allocation6] sm:$0xff]  ;;  %p939_p9 = pnand %p938_p8, %p1156_p7  ;;  %s943_s10 = scalar_lea.vmem %s942_s13, 256 }
  0x53   : > { %703 = vmatpush3.msra.mxu0 %v330_v3  ;;  %738 = vmatpush3.msra.mxu1 %v429_v8  ;;  %v316_v21 = vld [vmem:[%s1189_s1] sm:$0xff]  ;;  %v425_v24 = vld [vmem:[#allocation8 + $0x48] sm:$0xff]  ;;  %v424_v25 = vld [vmem:[#allocation8 + $0x40] sm:$0xff]  ;;  %p944_p2 = scmp.lt.s32.totalorder %s532_s17, %s942_s13  ;;  %p945_p13 = scmp.lt.s32.totalorder %s943_s10, %s937_s11 }
  0x54   : > { %704 = vmatprep.subr.mxu0 %v1028_v0  ;;  %739 = vmatprep.subr.mxu1 %v1028_v0  ;;  %v427_v22 = vld [vmem:[#allocation8 + $0x58] sm:$0xff]  ;;  %v426_v23 = vld [vmem:[#allocation8 + $0x50] sm:$0xff]  ;;  %v421_v28 = vld [vmem:[#allocation8 + $0x28] sm:$0xff]  ;;  %p940_p11 = pneg %p939_p9 }
  0x55   : > { %705 = vmatpush3.msra.mxu0 %v329_v4  ;;  %740 = vmatpush3.msra.mxu1 %v428_v10  ;;  %v423_v26 = vld [vmem:[#allocation8 + $0x38] sm:$0xff]  ;;  %v422_v27 = vld [vmem:[#allocation8 + $0x30] sm:$0xff]  ;;  %v420_v29 = vld [vmem:[#allocation8 + $0x20] sm:$0xff]  ;;  %p946_p0 = por %p945_p13, %p944_p2 }
  0x56   : > { %706 = vmatprep.subr.mxu0 %v1028_v0  ;;  %741 = vmatprep.subr.mxu1 %v1028_v0  ;;  %v419_v30 = vld [vmem:[#allocation8 + $0x18] sm:$0xff]  ;;  %v418_v31 = vld [vmem:[#allocation8 + $0x10] sm:$0xff]  ;;  %v417_v32 = vld [vmem:[#allocation8 + $0x8] sm:$0xff] }
  0x57   : > { %707 = vmatpush3.msra.mxu0 %v328_v6  ;;  %742 = vmatpush3.msra.mxu1 %v427_v22  ;;  %v416_v33 = vld [vmem:[#allocation8] sm:$0xff]  ;;  %v658_v34 = vld [vmem:[%s1290_s2] ss:$0 sm:$0xff]  ;;  %p947_p5 = pnand %p946_p0, %p940_p11 }
  0x58   : > { %708 = vmatprep.subr.mxu0 %v1028_v0  ;;  %743 = vmatprep.subr.mxu1 %v1028_v0  ;;  %v659_v43 = vld [vmem:[%s1292_s4] ss:$0 sm:$0xff] }
  0x59   : > { %709 = vmatpush3.msra.mxu0 %v327_v9  ;;  %744 = vmatpush3.msra.mxu1 %v426_v23 }
  0x5a   : > { %710 = vmatprep.subr.mxu0 %v1028_v0  ;;  %745 = vmatprep.subr.mxu1 %v1028_v0 }
  0x5b   : > { %711 = vmatpush3.msra.mxu0 %v326_v11  ;;  %746 = vmatpush3.msra.mxu1 %v425_v24 }
  0x5c   : > { %712 = vmatprep.subr.mxu0 %v1028_v0  ;;  %747 = vmatprep.subr.mxu1 %v1028_v0 }
  0x5d   : > { %713 = vmatpush3.msra.mxu0 %v325_v12  ;;  %748 = vmatpush3.msra.mxu1 %v424_v25 }
  0x5e   : > { %714 = vmatprep.subr.mxu0 %v1028_v0  ;;  %749 = vmatprep.subr.mxu1 %v1028_v0 }
  0x5f   : > { %715 = vmatpush3.msra.mxu0 %v324_v13  ;;  %750 = vmatpush3.msra.mxu1 %v423_v26 }
  0x60   : > { %716 = vmatprep.subr.mxu0 %v1028_v0  ;;  %751 = vmatprep.subr.mxu1 %v1028_v0 }
  0x61   : > { %717 = vmatpush3.msra.mxu0 %v323_v14  ;;  %752 = vmatpush3.msra.mxu1 %v422_v27 }
  0x62   : > { %718 = vmatprep.subr.mxu0 %v1028_v0  ;;  %753 = vmatprep.subr.mxu1 %v1028_v0 }
  0x63   : > { %719 = vmatpush3.msra.mxu0 %v322_v15  ;;  %754 = vmatpush3.msra.mxu1 %v421_v28 }
  0x64   : > { %720 = vmatprep.subr.mxu0 %v1028_v0  ;;  %755 = vmatprep.subr.mxu1 %v1028_v0 }
  0x65   : > { %721 = vmatpush3.msra.mxu0 %v321_v16  ;;  %756 = vmatpush3.msra.mxu1 %v420_v29 }
  0x66   : > { %722 = vmatprep.subr.mxu0 %v1028_v0  ;;  %757 = vmatprep.subr.mxu1 %v1028_v0 }
  0x67   : > { %723 = vmatpush3.msra.mxu0 %v320_v17  ;;  %758 = vmatpush3.msra.mxu1 %v419_v30 }
  0x68   : > { %724 = vmatprep.subr.mxu0 %v1028_v0  ;;  %759 = vmatprep.subr.mxu1 %v1028_v0 }
  0x69   : > { %725 = vmatpush3.msra.mxu0 %v319_v18  ;;  %760 = vmatpush3.msra.mxu1 %v418_v31 }
  0x6a   : > { %726 = vmatprep.subr.mxu0 %v1028_v0  ;;  %761 = vmatprep.subr.mxu1 %v1028_v0 }
  0x6b   : > { %727 = vmatpush3.msra.mxu0 %v318_v19  ;;  %762 = vmatpush3.msra.mxu1 %v417_v32 }
  0x6c   : > { %728 = vmatprep.subr.mxu0 %v1028_v0  ;;  %763 = vmatprep.subr.mxu1 %v1028_v0 }
  0x6d   : > { %729 = vmatpush3.msra.mxu0 %v317_v20  ;;  %764 = vmatpush3.msra.mxu1 %v416_v33 }
  0x6e   : > { %731 = vmatmul.mubr.f32.vlgmr.msra.gmra.mxu0 %v316_v21 }
 0x12e   : > { %v406_v35 = vpop.f32.mrf.mxu0 }
 0x12f   : > { %v407_v36 = vadd.f32 %v658_v34, %v406_v35 }
 0x130   : > { %v732_v37 = vpop.f32.mrf.mxu0 }
 0x131   : > { %v411_v38 = vmul.f32 0.70710677, %v407_v36  ;;  %v410_v40 = vmul.f32 0.5, %v407_v36 }
 0x133   : > { %855 = verf.f32 %v411_v38 }
 0x140   : > { %v856_v39 = vpop.eup %855 }
 0x141   : > { %v413_v41 = vadd.f32 1.0, %v856_v39 }
 0x143   : > { %v414_v42 = vmul.f32 %v413_v41, %v410_v40 }
 0x145   : > { %766 = vmatmul.mubr.f32.vlgmr.msra.gmra.mxu1 %v414_v42 }
 0x205   : > { %v498_v44 = vpop.f32.mrf.mxu1 }
 0x206   : > { %v515_v45 = vadd.f32 %v659_v43, %v498_v44 }
 0x207   : > { %v767_v46 = vpop.f32.mrf.mxu1 }
 0x208   : > { %516 = vst [vmem:[%s306_s16] sm:$0xff] %v515_v45 }
 0x209   : > { %950 = shalt.err (!%p947_p5)
}
 0x20a   : > { %s951_s1 = scalar_lea.hbm %s1246_s8, 128  ;;  %s955_s28 = scalar_lea.hbm %s1293_s5, 256 }
 0x20b   : > { %p952_p10 = scmp.ne.s32.totalorder %s1246_s8, %s951_s1  ;;  %p956_p6 = scmp.lt.s32.totalorder %s1246_s8, %s1293_s5 }
 0x20c   : > { %p957_p12 = scmp.lt.s32.totalorder %s955_s28, %s951_s1 }
 0x20d   : > { %p953_p1 = pnand %p952_p10, %p1156_p7 }
 0x20e   : > { %p958_p3 = por %p957_p12, %p956_p6 }
 0x20f   : > { %p954_p4 = pneg %p953_p1 }
 0x211   : > { %p959_p8 = pnand %p958_p3, %p954_p4 }
 0x213   : > { %962 = shalt.err (!%p959_p8)
}
 0x214   : > { %778 = dma.vmem_to_hbm [thread:$0]  (%p1156_p7), %s532_s17, 128, %s1246_s8, %s518_s6  }
 0x215 PF: > { %s543_s15 = sand.u32 1, %s1001_s18   ;;  %p1309_p9 = scmp.ne.s32.totalorder %s1301_s29, 0 }
 0x216   : > { %p1310_p11 = scmp.ge.s32.totalorder %s1021_s23, 2  ;;  %s544_s16 = scalar_lea.sflag [#allocation5], %s543_s15 }
 0x218   : > { %p792_p2 = pnand %p1310_p11, %p1309_p9 }
 0x21a   : > { %p793_p13 = pneg %p792_p2 }
 0x21c   : > { %996 = dma.done.wait (%p793_p13), %s544_s16, 128  }
 0x21d   : > { %998 = vsyncadd (%p793_p13), %s544_s16, 4294967168  ;;  %s22_s23 = sadd.s32 1, %s1021_s23   ;;  %s1311_s18 = smov %s1005_s19 }
 0x21e   : > { %p19_p0 = scmp.ge.s32.totalorder %s22_s23, 4   ;;  %s1312_s19 = smov %s1009_s20 }
 0x21f   : > { %s1313_s20 = smov %s1165_s12  ;;  %s1314_s21 = smov %s1017_s22 }
 0x220   : > { %s1315_s22 = smov %s1317_s25  ;;  %21 = sbr.rel (!%p19_p0) target bundleno = 9 (0x9), region = 106 }
 0x225   :  { %549 = vsyncpa [#allocation4], 1 }
 0x226   :  { %551 = vsyncpa [#allocation4 + $0x1], 1 }
 0x227   :  { %552 = vsyncpa [#allocation7], 1 }
 0x228   :  { %553 = vsyncpa [#allocation5], 1 }
 0x229   :  { %555 = vsyncpa [#allocation5 + $0x1], 1 }

</bundles_post_ra>
